<compile_context>
chip_gen: v5e
topology: v5e:2x2
jax: 0.10.0
libtpu: 0.0.40
codegen_flags: <defaults>
</compile_context>

<pallas_src>
import jax
import jax.numpy as jnp
from jax.experimental import pallas as pl
from jax.experimental.pallas import tpu as pltpu

# Logical dims (from the PyTorch module)
D_IN, D_H, D_Z = 100, 50, 5
# Padded dims used only *inside* the kernel / for the (tiny) packed weights
D_IN_P, D_H_P, D_Z_P = 128, 64, 16
D_ML = 2 * D_Z_P                     # fused mu||logvar projection width (32)

_TB_MIN, _TB_MAX = 256, 4096         # batch-tile bounds (rows)


def _round_up(n, m):
    return ((n + m - 1) // m) * m


def _pick_tb(batch):
    """Batch-tile rows: multiple of 16 (bf16 packs 16 rows per sublane tile).
    Aim for >=4 grid tiles on large batches (2 per v7x TensorCore) while
    keeping tiles large (<=4096) to amortize per-grid-step overhead on the
    single-core v5e/v6e."""
    tb = _round_up(max(1, -(-batch // 4)), 16)      # ~cdiv(B, 4), 16-aligned
    tb = max(_TB_MIN, min(_TB_MAX, tb))
    tb = min(tb, _round_up(batch, 16))              # don't blow past the batch
    return max(16, tb)


def _vae_fwd_kernel(x_ref, eps_ref,
                    w1_ref, b1_ref, w2_ref, b2_ref,
                    w3_ref, b3_ref, w4_ref, b4_ref,
                    recon_ref, mu_ref, logvar_ref,
                    xpad_ref, epspad_ref):
    tb = x_ref.shape[0]

    # ---- lane-pad the unpadded HBM streams inside VMEM.  Pad lanes are
    #      zeroed every step so padded matmul columns stay exactly zero
    #      (correct under any grid partitioning across TensorCores).
    xpad_ref[:, :D_IN] = x_ref[...]
    xpad_ref[:, D_IN:] = jnp.zeros((tb, D_IN_P - D_IN), xpad_ref.dtype)
    epspad_ref[:, :D_Z] = eps_ref[...]
    epspad_ref[:, D_Z:] = jnp.zeros((tb, D_Z_P - D_Z), epspad_ref.dtype)

    # ---- encode: h1 = relu(x @ W1 + b1)  (bf16 MXU operands, f32 accumulate)
    h1 = jnp.dot(xpad_ref[...], w1_ref[...],
                 preferred_element_type=jnp.float32) + b1_ref[...]
    h1 = jnp.maximum(h1, 0.0).astype(jnp.bfloat16)

    # ---- fused mu||logvar projection: one (TB,64)x(64,32) bf16 matmul
    y = jnp.dot(h1, w2_ref[...], preferred_element_type=jnp.float32) + b2_ref[...]
    mu = y[:, :D_Z_P]            # lanes  0..15 (valid 0..4,  rest exactly 0)
    logvar = y[:, D_Z_P:]        # lanes 16..31 (valid 16..20, rest exactly 0)

    # ---- reparameterise (f32): z = mu + eps * exp(0.5*logvar); pad lanes: 0
    z = mu + epspad_ref[...] * jnp.exp(0.5 * logvar)

    # ---- decode: h3 = relu(z @ W3 + b3); recon = sigmoid(h3 @ W4 + b4)
    h3 = jnp.maximum(
        jnp.dot(z.astype(jnp.bfloat16), w3_ref[...],
                preferred_element_type=jnp.float32) + b3_ref[...], 0.0)
    logits = jnp.dot(h3.astype(jnp.bfloat16), w4_ref[...],
                     preferred_element_type=jnp.float32) + b4_ref[...]

    # sigmoid via the EUP path: exp + approximate reciprocal (separate slots)
    recon = pl.reciprocal(1.0 + jnp.exp(-logits), approx=True)

    # Stores: 100-lane masked store for recon (far cheaper than an extra HBM
    # pass); narrow 5-lane stores for mu/logvar (~6% of traffic, non-lever).
    recon_ref[...] = recon[:, :D_IN].astype(recon_ref.dtype)
    mu_ref[...] = mu[:, :D_Z]
    logvar_ref[...] = logvar[:, :D_Z]


@jax.jit
def vae_forward(x, eps, packed):
    """x: (B, 100), eps: (B, 5), packed: dict from pack_params().

    Returns (recon bf16 (B,100), mu f32 (B,5), logvar f32 (B,5))."""
    B = x.shape[0]
    TB = _pick_tb(B)
    nb = pl.cdiv(B, TB)          # partial last tile handled by masked writes

    # bf16 HBM stream for x (no-op if the caller already holds bf16).
    x = x.astype(jnp.bfloat16)
    eps = eps.astype(jnp.float32)

    def tiled(feat):
        return pl.BlockSpec((TB, feat), lambda i: (i, 0))

    def resident(a):             # weights stay VMEM-resident across the grid
        return pl.BlockSpec(a.shape, lambda i: (0, 0))

    weights = (packed["w1"], packed["b1"], packed["w2"], packed["b2"],
               packed["w3"], packed["b3"], packed["w4"], packed["b4"])

    recon, mu, logvar = pl.pallas_call(
        _vae_fwd_kernel,
        out_shape=(jax.ShapeDtypeStruct((B, D_IN), jnp.bfloat16),
                   jax.ShapeDtypeStruct((B, D_Z), jnp.float32),
                   jax.ShapeDtypeStruct((B, D_Z), jnp.float32)),
        grid=(nb,),
        in_specs=[tiled(D_IN), tiled(D_Z)] + [resident(a) for a in weights],
        out_specs=(tiled(D_IN), tiled(D_Z), tiled(D_Z)),
        scratch_shapes=[pltpu.VMEM((TB, D_IN_P), jnp.bfloat16),
                        pltpu.VMEM((TB, D_Z_P), jnp.float32)],
        compiler_params=pltpu.CompilerParams(
            dimension_semantics=("parallel",)),   # batch tiles over TCs (v7x)
    )(x, eps, *weights)
    return recon, mu, logvar


def init_params(key):
    """Deterministic init matching nn.Linear shapes, stored as [in, out]."""
    keys = jax.random.split(key, 10)

    def linear(kw, kb, fan_in, fan_out):
        bound = 1.0 / jnp.sqrt(fan_in)
        w = jax.random.uniform(kw, (fan_in, fan_out), jnp.float32, -bound, bound)
        b = jax.random.uniform(kb, (1, fan_out), jnp.float32, -bound, bound)
        return w, b

    w1, b1 = linear(keys[0], keys[1], D_IN, D_H)    # l1:  100 -> 50
    w21, b21 = linear(keys[2], keys[3], D_H, D_Z)   # l21: 50 -> 5
    w22, b22 = linear(keys[4], keys[5], D_H, D_Z)   # l22: 50 -> 5
    w3, b3 = linear(keys[6], keys[7], D_Z, D_H)     # l3:  5 -> 50
    w4, b4 = linear(keys[8], keys[9], D_H, D_IN)    # l4:  50 -> 100
    return dict(w1=w1, b1=b1, w21=w21, b21=b21, w22=w22, b22=b22,
                w3=w3, b3=b3, w4=w4, b4=b4)


def pack_params(p):
    """One-time packing: pad weights/biases to lane/sublane-aligned shapes
    (zero padding), fuse the mu/logvar projection, cast weights to bf16.
    This is offline param prep, not a per-call HBM pass."""
    w1 = jnp.zeros((D_IN_P, D_H_P), jnp.float32).at[:D_IN, :D_H].set(p["w1"])
    b1 = jnp.zeros((1, D_H_P), jnp.float32).at[:, :D_H].set(p["b1"])
    w2 = (jnp.zeros((D_H_P, D_ML), jnp.float32)
          .at[:D_H, :D_Z].set(p["w21"])
          .at[:D_H, D_Z_P:D_Z_P + D_Z].set(p["w22"]))
    b2 = (jnp.zeros((1, D_ML), jnp.float32)
          .at[:, :D_Z].set(p["b21"])
          .at[:, D_Z_P:D_Z_P + D_Z].set(p["b22"]))
    w3 = jnp.zeros((D_Z_P, D_H_P), jnp.float32).at[:D_Z, :D_H].set(p["w3"])
    b3 = jnp.zeros((1, D_H_P), jnp.float32).at[:, :D_H].set(p["b3"])
    w4 = jnp.zeros((D_H_P, D_IN_P), jnp.float32).at[:D_H, :D_IN].set(p["w4"])
    b4 = jnp.zeros((1, D_IN_P), jnp.float32).at[:, :D_IN].set(p["b4"])
    bf = jnp.bfloat16
    return dict(w1=w1.astype(bf), b1=b1, w2=w2.astype(bf), b2=b2,
                w3=w3.astype(bf), b3=b3, w4=w4.astype(bf), b4=b4)


def vae_forward_ref(x, eps, p):
    """Pure-JAX f32 reference (matches the PyTorch forward)."""
    h1 = jnp.maximum(x @ p["w1"] + p["b1"], 0.0)
    mu = h1 @ p["w21"] + p["b21"]
    logvar = h1 @ p["w22"] + p["b22"]
    z = mu + eps * jnp.exp(0.5 * logvar)
    h3 = jnp.maximum(z @ p["w3"] + p["b3"], 0.0)
    recon = jax.nn.sigmoid(h3 @ p["w4"] + p["b4"])
    return recon, mu, logvar


def _check(a, b, atol=2e-2, rtol=2e-2):
    assert jnp.allclose(a, b, atol=atol, rtol=rtol), float(jnp.max(jnp.abs(a - b)))


if __name__ == "__main__":
    key = jax.random.PRNGKey(0)
    k_param, k_x, k_eps = jax.random.split(key, 3)

    params = init_params(k_param)
    packed = pack_params(params)

    # Small-shape run (single batch tile).
    B = 16
    x = jax.random.normal(k_x, (B, D_IN), jnp.float32)
    eps = jax.random.normal(k_eps, (B, D_Z), jnp.float32)   # torch.randn_like(std)

    recon, mu, logvar = vae_forward(x, eps, packed)
    jax.block_until_ready((recon, mu, logvar))

    r_ref, m_ref, lv_ref = vae_forward_ref(x, eps, params)
    assert recon.shape == (B, D_IN) and recon.dtype == jnp.bfloat16
    assert mu.shape == (B, D_Z) and logvar.shape == (B, D_Z)
    # bf16 streams/weights -> relaxed tolerance vs the f32 reference.
    _check(recon.astype(jnp.float32), r_ref)
    _check(mu, m_ref)
    _check(logvar, lv_ref)

    # Larger batch exercising the pipelined, megacore-parallel batch grid.
    B2 = 1024
    x2 = jax.random.normal(k_x, (B2, D_IN), jnp.float32)
    eps2 = jax.random.normal(k_eps, (B2, D_Z), jnp.float32)
    r2, mu2, lv2 = vae_forward(x2, eps2, packed)
    jax.block_until_ready((r2, mu2, lv2))
    r2_ref, mu2_ref, lv2_ref = vae_forward_ref(x2, eps2, params)
    _check(r2.astype(jnp.float32), r2_ref)
    _check(mu2, mu2_ref)
    _check(lv2, lv2_ref)

    print("KERNEL_OK")
</pallas_src>

<mosaic_0001>
module attributes {stable_mosaic.version = 11 : i64} {
  func.func @_vae_fwd_kernel(%arg0: i32, %arg1: memref<16x100xbf16, #tpu.memory_space<vmem>>, %arg2: memref<16x5xf32, #tpu.memory_space<vmem>>, %arg3: memref<128x64xbf16, #tpu.memory_space<vmem>>, %arg4: memref<1x64xf32, #tpu.memory_space<vmem>>, %arg5: memref<64x32xbf16, #tpu.memory_space<vmem>>, %arg6: memref<1x32xf32, #tpu.memory_space<vmem>>, %arg7: memref<16x64xbf16, #tpu.memory_space<vmem>>, %arg8: memref<1x64xf32, #tpu.memory_space<vmem>>, %arg9: memref<64x128xbf16, #tpu.memory_space<vmem>>, %arg10: memref<1x128xf32, #tpu.memory_space<vmem>>, %arg11: memref<16x100xbf16, #tpu.memory_space<vmem>>, %arg12: memref<16x5xf32, #tpu.memory_space<vmem>>, %arg13: memref<16x5xf32, #tpu.memory_space<vmem>>, %arg14: memref<16x128xbf16, #tpu.memory_space<vmem>>, %arg15: memref<16x16xf32, #tpu.memory_space<vmem>>) attributes {dimension_semantics = [#tpu.dimension_semantics<parallel>], iteration_bounds = array<i64: 1>, scalar_prefetch = 0 : i64, scratch_operands = 2 : i64, tpu.core_type = #tpu.core_type<tc>, window_params = [{transform_indices = @transform_0, window_bounds = array<i64: 16, 100>}, {transform_indices = @transform_1, window_bounds = array<i64: 16, 5>}, {pipeline_mode = #tpu.pipeline_mode<synchronous>, transform_indices = @transform_2, window_bounds = array<i64: 128, 64>}, {pipeline_mode = #tpu.pipeline_mode<synchronous>, transform_indices = @transform_3, window_bounds = array<i64: 1, 64>}, {pipeline_mode = #tpu.pipeline_mode<synchronous>, transform_indices = @transform_4, window_bounds = array<i64: 64, 32>}, {pipeline_mode = #tpu.pipeline_mode<synchronous>, transform_indices = @transform_5, window_bounds = array<i64: 1, 32>}, {pipeline_mode = #tpu.pipeline_mode<synchronous>, transform_indices = @transform_6, window_bounds = array<i64: 16, 64>}, {pipeline_mode = #tpu.pipeline_mode<synchronous>, transform_indices = @transform_7, window_bounds = array<i64: 1, 64>}, {pipeline_mode = #tpu.pipeline_mode<synchronous>, transform_indices = @transform_8, window_bounds = array<i64: 64, 128>}, {pipeline_mode = #tpu.pipeline_mode<synchronous>, transform_indices = @transform_9, window_bounds = array<i64: 1, 128>}, {transform_indices = @transform_10, window_bounds = array<i64: 16, 100>}, {transform_indices = @transform_11, window_bounds = array<i64: 16, 5>}, {transform_indices = @transform_12, window_bounds = array<i64: 16, 5>}]} {
    %c0 = arith.constant 0 : index
    %c0_0 = arith.constant 0 : index
    %0 = vector.load %arg1[%c0, %c0_0] : memref<16x100xbf16, #tpu.memory_space<vmem>>, vector<16x100xbf16>
    %c0_1 = arith.constant 0 : index
    %c0_2 = arith.constant 0 : index
    %1 = vector.load %arg14[%c0_1, %c0_2] : memref<16x128xbf16, #tpu.memory_space<vmem>>, vector<16x100xbf16>
    tpu.vector_store %arg14[%c0_1, %c0_2], %0 {strides = array<i32>} : memref<16x128xbf16, #tpu.memory_space<vmem>>, vector<16x100xbf16>,
    %cst = arith.constant 0.000000e+00 : bf16
    %2 = vector.broadcast %cst : bf16 to vector<16x28xbf16>
    %c0_3 = arith.constant 0 : index
    %c100 = arith.constant 100 : index
    %3 = vector.load %arg14[%c0_3, %c100] : memref<16x128xbf16, #tpu.memory_space<vmem>>, vector<16x28xbf16>
    tpu.vector_store %arg14[%c0_3, %c100], %2 {strides = array<i32>} : memref<16x128xbf16, #tpu.memory_space<vmem>>, vector<16x28xbf16>,
    %c0_4 = arith.constant 0 : index
    %c0_5 = arith.constant 0 : index
    %4 = vector.load %arg2[%c0_4, %c0_5] : memref<16x5xf32, #tpu.memory_space<vmem>>, vector<16x5xf32>
    %c0_6 = arith.constant 0 : index
    %c0_7 = arith.constant 0 : index
    %5 = vector.load %arg15[%c0_6, %c0_7] : memref<16x16xf32, #tpu.memory_space<vmem>>, vector<16x5xf32>
    tpu.vector_store %arg15[%c0_6, %c0_7], %4 {strides = array<i32>} : memref<16x16xf32, #tpu.memory_space<vmem>>, vector<16x5xf32>,
    %cst_8 = arith.constant 0.000000e+00 : f32
    %6 = vector.broadcast %cst_8 : f32 to vector<16x11xf32>
    %c0_9 = arith.constant 0 : index
    %c5 = arith.constant 5 : index
    %7 = vector.load %arg15[%c0_9, %c5] : memref<16x16xf32, #tpu.memory_space<vmem>>, vector<16x11xf32>
    tpu.vector_store %arg15[%c0_9, %c5], %6 {strides = array<i32>} : memref<16x16xf32, #tpu.memory_space<vmem>>, vector<16x11xf32>,
    %c0_10 = arith.constant 0 : index
    %c0_11 = arith.constant 0 : index
    %8 = vector.load %arg14[%c0_10, %c0_11] : memref<16x128xbf16, #tpu.memory_space<vmem>>, vector<16x128xbf16>
    %c0_12 = arith.constant 0 : index
    %c0_13 = arith.constant 0 : index
    %9 = vector.load %arg3[%c0_12, %c0_13] : memref<128x64xbf16, #tpu.memory_space<vmem>>, vector<128x64xbf16>
    %cst_14 = arith.constant dense<0.000000e+00> : vector<16x64xf32>
    %10 = tpu.matmul %8, %9, %cst_14 {dimension_numbers = #tpu.dot_dimension_numbers<[1], [0], [0], [1], [0, 0, 1, 1], [], []>} : vector<16x128xbf16>, vector<128x64xbf16>, vector<16x64xf32> -> vector<16x64xf32>
    %c0_15 = arith.constant 0 : index
    %c0_16 = arith.constant 0 : index
    %11 = vector.load %arg4[%c0_15, %c0_16] : memref<1x64xf32, #tpu.memory_space<vmem>>, vector<1x64xf32>
    %12 = vector.broadcast %11 : vector<1x64xf32> to vector<16x64xf32>
    %13 = arith.addf %10, %12 : vector<16x64xf32>
    %cst_17 = arith.constant 0.000000e+00 : f32
    %14 = vector.broadcast %cst_17 : f32 to vector<16x64xf32>
    %15 = arith.maximumf %13, %14 : vector<16x64xf32>
    %16 = arith.truncf %15 : vector<16x64xf32> to vector<16x64xbf16>
    %c0_18 = arith.constant 0 : index
    %c0_19 = arith.constant 0 : index
    %17 = vector.load %arg5[%c0_18, %c0_19] : memref<64x32xbf16, #tpu.memory_space<vmem>>, vector<64x32xbf16>
    %cst_20 = arith.constant dense<0.000000e+00> : vector<16x32xf32>
    %18 = tpu.matmul %16, %17, %cst_20 {dimension_numbers = #tpu.dot_dimension_numbers<[1], [0], [0], [1], [0, 0, 1, 1], [], []>} : vector<16x64xbf16>, vector<64x32xbf16>, vector<16x32xf32> -> vector<16x32xf32>
    %c0_21 = arith.constant 0 : index
    %c0_22 = arith.constant 0 : index
    %19 = vector.load %arg6[%c0_21, %c0_22] : memref<1x32xf32, #tpu.memory_space<vmem>>, vector<1x32xf32>
    %20 = vector.broadcast %19 : vector<1x32xf32> to vector<16x32xf32>
    %21 = arith.addf %18, %20 : vector<16x32xf32>
    %22 = vector.extract_strided_slice %21 {offsets = [0, 0], sizes = [16, 16], strides = [1, 1]} : vector<16x32xf32> to vector<16x16xf32>
    %23 = vector.extract_strided_slice %21 {offsets = [0, 16], sizes = [16, 16], strides = [1, 1]} : vector<16x32xf32> to vector<16x16xf32>
    %c0_23 = arith.constant 0 : index
    %c0_24 = arith.constant 0 : index
    %24 = vector.load %arg15[%c0_23, %c0_24] : memref<16x16xf32, #tpu.memory_space<vmem>>, vector<16x16xf32>
    %cst_25 = arith.constant 5.000000e-01 : f32
    %25 = vector.broadcast %cst_25 : f32 to vector<16x16xf32>
    %26 = arith.mulf %25, %23 : vector<16x16xf32>
    %27 = math.exp %26 : vector<16x16xf32>
    %28 = arith.mulf %24, %27 : vector<16x16xf32>
    %29 = arith.addf %22, %28 : vector<16x16xf32>
    %30 = arith.truncf %29 : vector<16x16xf32> to vector<16x16xbf16>
    %c0_26 = arith.constant 0 : index
    %c0_27 = arith.constant 0 : index
    %31 = vector.load %arg7[%c0_26, %c0_27] : memref<16x64xbf16, #tpu.memory_space<vmem>>, vector<16x64xbf16>
    %cst_28 = arith.constant dense<0.000000e+00> : vector<16x64xf32>
    %32 = tpu.matmul %30, %31, %cst_28 {dimension_numbers = #tpu.dot_dimension_numbers<[1], [0], [0], [1], [0, 0, 1, 1], [], []>} : vector<16x16xbf16>, vector<16x64xbf16>, vector<16x64xf32> -> vector<16x64xf32>
    %c0_29 = arith.constant 0 : index
    %c0_30 = arith.constant 0 : index
    %33 = vector.load %arg8[%c0_29, %c0_30] : memref<1x64xf32, #tpu.memory_space<vmem>>, vector<1x64xf32>
    %34 = vector.broadcast %33 : vector<1x64xf32> to vector<16x64xf32>
    %35 = arith.addf %32, %34 : vector<16x64xf32>
    %cst_31 = arith.constant 0.000000e+00 : f32
    %36 = vector.broadcast %cst_31 : f32 to vector<16x64xf32>
    %37 = arith.maximumf %35, %36 : vector<16x64xf32>
    %38 = arith.truncf %37 : vector<16x64xf32> to vector<16x64xbf16>
    %c0_32 = arith.constant 0 : index
    %c0_33 = arith.constant 0 : index
    %39 = vector.load %arg9[%c0_32, %c0_33] : memref<64x128xbf16, #tpu.memory_space<vmem>>, vector<64x128xbf16>
    %cst_34 = arith.constant dense<0.000000e+00> : vector<16x128xf32>
    %40 = tpu.matmul %38, %39, %cst_34 {dimension_numbers = #tpu.dot_dimension_numbers<[1], [0], [0], [1], [0, 0, 1, 1], [], []>} : vector<16x64xbf16>, vector<64x128xbf16>, vector<16x128xf32> -> vector<16x128xf32>
    %c0_35 = arith.constant 0 : index
    %c0_36 = arith.constant 0 : index
    %41 = vector.load %arg10[%c0_35, %c0_36] : memref<1x128xf32, #tpu.memory_space<vmem>>, vector<1x128xf32>
    %42 = vector.broadcast %41 : vector<1x128xf32> to vector<16x128xf32>
    %43 = arith.addf %40, %42 : vector<16x128xf32>
    %cst_37 = arith.constant 0.000000e+00 : f32
    %44 = vector.broadcast %cst_37 : f32 to vector<16x128xf32>
    %45 = arith.subf %44, %43 : vector<16x128xf32>
    %46 = math.exp %45 : vector<16x128xf32>
    %cst_38 = arith.constant 1.000000e+00 : f32
    %47 = vector.broadcast %cst_38 : f32 to vector<16x128xf32>
    %48 = arith.addf %47, %46 : vector<16x128xf32>
    %49 = tpu.reciprocal %48 {approx = true} : vector<16x128xf32> -> vector<16x128xf32>
    %50 = vector.extract_strided_slice %49 {offsets = [0, 0], sizes = [16, 100], strides = [1, 1]} : vector<16x128xf32> to vector<16x100xf32>
    %51 = arith.truncf %50 : vector<16x100xf32> to vector<16x100xbf16>
    %c0_39 = arith.constant 0 : index
    %c0_40 = arith.constant 0 : index
    %52 = vector.load %arg11[%c0_39, %c0_40] : memref<16x100xbf16, #tpu.memory_space<vmem>>, vector<16x100xbf16>
    tpu.vector_store %arg11[%c0_39, %c0_40], %51 {strides = array<i32>} : memref<16x100xbf16, #tpu.memory_space<vmem>>, vector<16x100xbf16>,
    %53 = vector.extract_strided_slice %22 {offsets = [0, 0], sizes = [16, 5], strides = [1, 1]} : vector<16x16xf32> to vector<16x5xf32>
    %c0_41 = arith.constant 0 : index
    %c0_42 = arith.constant 0 : index
    %54 = vector.load %arg12[%c0_41, %c0_42] : memref<16x5xf32, #tpu.memory_space<vmem>>, vector<16x5xf32>
    tpu.vector_store %arg12[%c0_41, %c0_42], %53 {strides = array<i32>} : memref<16x5xf32, #tpu.memory_space<vmem>>, vector<16x5xf32>,
    %55 = vector.extract_strided_slice %23 {offsets = [0, 0], sizes = [16, 5], strides = [1, 1]} : vector<16x16xf32> to vector<16x5xf32>
    %c0_43 = arith.constant 0 : index
    %c0_44 = arith.constant 0 : index
    %56 = vector.load %arg13[%c0_43, %c0_44] : memref<16x5xf32, #tpu.memory_space<vmem>>, vector<16x5xf32>
    tpu.vector_store %arg13[%c0_43, %c0_44], %55 {strides = array<i32>} : memref<16x5xf32, #tpu.memory_space<vmem>>, vector<16x5xf32>,
    return
  }
  func.func @transform_0(%arg0: i32) -> (i32, i32) {
    %c0_i32 = arith.constant 0 : i32
    %c0_i32_0 = arith.constant 0 : i32
    return %arg0, %c0_i32 : i32, i32
  }
  func.func @transform_1(%arg0: i32) -> (i32, i32) {
    %c0_i32 = arith.constant 0 : i32
    %c0_i32_0 = arith.constant 0 : i32
    return %arg0, %c0_i32 : i32, i32
  }
  func.func @transform_2(%arg0: i32) -> (i32, i32) {
    %c0_i32 = arith.constant 0 : i32
    %c0_i32_0 = arith.constant 0 : i32
    %c0_i32_1 = arith.constant 0 : i32
    return %c0_i32, %c0_i32_0 : i32, i32
  }
  func.func @transform_3(%arg0: i32) -> (i32, i32) {
    %c0_i32 = arith.constant 0 : i32
    %c0_i32_0 = arith.constant 0 : i32
    %c0_i32_1 = arith.constant 0 : i32
    return %c0_i32, %c0_i32_0 : i32, i32
  }
  func.func @transform_4(%arg0: i32) -> (i32, i32) {
    %c0_i32 = arith.constant 0 : i32
    %c0_i32_0 = arith.constant 0 : i32
    %c0_i32_1 = arith.constant 0 : i32
    return %c0_i32, %c0_i32_0 : i32, i32
  }
  func.func @transform_5(%arg0: i32) -> (i32, i32) {
    %c0_i32 = arith.constant 0 : i32
    %c0_i32_0 = arith.constant 0 : i32
    %c0_i32_1 = arith.constant 0 : i32
    return %c0_i32, %c0_i32_0 : i32, i32
  }
  func.func @transform_6(%arg0: i32) -> (i32, i32) {
    %c0_i32 = arith.constant 0 : i32
    %c0_i32_0 = arith.constant 0 : i32
    %c0_i32_1 = arith.constant 0 : i32
    return %c0_i32, %c0_i32_0 : i32, i32
  }
  func.func @transform_7(%arg0: i32) -> (i32, i32) {
    %c0_i32 = arith.constant 0 : i32
    %c0_i32_0 = arith.constant 0 : i32
    %c0_i32_1 = arith.constant 0 : i32
    return %c0_i32, %c0_i32_0 : i32, i32
  }
  func.func @transform_8(%arg0: i32) -> (i32, i32) {
    %c0_i32 = arith.constant 0 : i32
    %c0_i32_0 = arith.constant 0 : i32
    %c0_i32_1 = arith.constant 0 : i32
    return %c0_i32, %c0_i32_0 : i32, i32
  }
  func.func @transform_9(%arg0: i32) -> (i32, i32) {
    %c0_i32 = arith.constant 0 : i32
    %c0_i32_0 = arith.constant 0 : i32
    %c0_i32_1 = arith.constant 0 : i32
    return %c0_i32, %c0_i32_0 : i32, i32
  }
  func.func @transform_10(%arg0: i32) -> (i32, i32) {
    %c0_i32 = arith.constant 0 : i32
    %c0_i32_0 = arith.constant 0 : i32
    return %arg0, %c0_i32 : i32, i32
  }
  func.func @transform_11(%arg0: i32) -> (i32, i32) {
    %c0_i32 = arith.constant 0 : i32
    %c0_i32_0 = arith.constant 0 : i32
    return %arg0, %c0_i32 : i32, i32
  }
  func.func @transform_12(%arg0: i32) -> (i32, i32) {
    %c0_i32 = arith.constant 0 : i32
    %c0_i32_0 = arith.constant 0 : i32
    return %arg0, %c0_i32 : i32, i32
  }
}

</mosaic_0001>

<bundles_post_ra>
// kernel: vae_forward.1
= control target key start
LH: loop header
LB: loop body
LE: loop exit
PB: predicated region body
PF: predicated region fallthrough
CT: control target
= control target key end

     0   :  { %vm42_vm0 = vcmask 814080   ;;  %vm45_vm1 = vcmask 1044256   ;;  %v503_v4 = vmov 0   ;;  %s676_s0 = inlined_call_operand.vmem [shape: bf16[16,100], index: 0, kind: input, shape index: {}]   ;;  %s677_s1 = inlined_call_operand.vmem [shape: f32[16,5], index: 1, kind: input, shape index: {}]   ;;  %s678_s2 = inlined_call_operand.vmem [shape: bf16[128,64], index: 2, kind: input, shape index: {}]   ;;  %s679_s3 = inlined_call_operand.vmem [shape: f32[1,64], index: 3, kind: input, shape index: {}]   ;;  %s680_s4 = inlined_call_operand.vmem [shape: bf16[64,32], index: 4, kind: input, shape index: {}]   ;;  %s681_s5 = inlined_call_operand.vmem [shape: f32[1,32], index: 5, kind: input, shape index: {}]   ;;  %s682_s6 = inlined_call_operand.vmem [shape: bf16[16,64], index: 6, kind: input, shape index: {}]   ;;  %s683_s7 = inlined_call_operand.vmem [shape: f32[1,64], index: 7, kind: input, shape index: {}]   ;;  %s684_s8 = inlined_call_operand.vmem [shape: bf16[64,128], index: 8, kind: input, shape index: {}]   ;;  %s685_s9 = inlined_call_operand.vmem [shape: f32[1,128], index: 9, kind: input, shape index: {}]   ;;  %s686_s10 = inlined_call_operand.hbm [shape: bf16[16,100], index: 10, kind: output, shape index: {0}]   ;;  %s687_s11 = inlined_call_operand.vmem [shape: f32[16,5], index: 11, kind: output, shape index: {1}]   ;;  %s688_s12 = inlined_call_operand.vmem [shape: f32[16,5], index: 12, kind: output, shape index: {2}]  }
   0x1   :  { %v445_v0 = vld [vmem:[%s678_s2 + $0x38] sm:$0xff]  ;;  %v444_v1 = vld [vmem:[%s678_s2 + $0x30] sm:$0xff]  ;;  %v40_v2 = vld [vmem:[%s676_s0] sm:$0xf] }
   0x2   :  { %132 = vmatpush.bf16.msra.mxu0 %v445_v0  ;;  %v41_v3 = vld [vmem:[%s676_s0 + $0x4] sm:$0xf]  ;;  %43 = vst.msk [vmem:[#allocation2] sm:$0xf] %vm42_vm0, %v40_v2  ;;  %v443_v5 = vld [vmem:[%s678_s2 + $0x28] sm:$0xff] }
   0x3   :  { %44 = vst.msk [vmem:[#allocation2 + $0x4] sm:$0xf] %vm42_vm0, %v41_v3 }
   0x4   :  { %46 = vst.msk [vmem:[#allocation2] sm:$0xf] %vm45_vm1, %v503_v4 }
   0x5   :  { %47 = vst.msk [vmem:[#allocation2 + $0x4] sm:$0xf] %vm45_vm1, %v503_v4 }
   0x6   :  { %133 = vmatpush.bf16.msra.mxu0 %v444_v1 }
   0x7   :  { %18 = vsyncpa [#allocation5], 0  ;;  %v442_v6 = vld [vmem:[%s678_s2 + $0x20] sm:$0xff]  ;;  %v441_v7 = vld [vmem:[%s678_s2 + $0x18] sm:$0xff]  ;;  %vm50_vm2 = vcmask 39936   ;;  %vm53_vm3 = vcmask 130088  }
   0x8   :  { %v440_v8 = vld [vmem:[%s678_s2 + $0x10] sm:$0xff]  ;;  %v439_v9 = vld [vmem:[%s678_s2 + $0x8] sm:$0xff]  ;;  %v438_v10 = vld [vmem:[%s678_s2] sm:$0xff]  ;;  %v504_v18 = vmov 0.0   ;;  %vm185_vm4 = vcmask 523264   ;;  %vm236_vm5 = vcmask 130048  }
   0x9   :  { %v449_v12 = vld [vmem:[%s680_s4 + $0x18] sm:$0xff]  ;;  %v448_v13 = vld [vmem:[%s680_s4 + $0x10] sm:$0xff]  ;;  %v447_v14 = vld [vmem:[%s680_s4 + $0x8] sm:$0xff]  ;;  %s342_s0 = sshll.u32 %s686_s10, 4  ;;  %s508_s15 = smov 4   ;;  %s343_s0 = int_to_ptr.hbm [resolvable:$true] %s342_s0 }
   0xa   :  { %134 = vmatpush.bf16.msra.mxu0 %v443_v5  ;;  %193 = vmatpush.bf16.msra.mxu1 %v449_v12  ;;  %v446_v15 = vld [vmem:[%s680_s4] sm:$0xff]  ;;  %v49_v17 = vld [vmem:[%s677_s1 + $0x8] sm:$0xff]  ;;  %v454_v50 = vld [vmem:[%s684_s8 + $0x18] sm:$0xff] }
   0xb   :  { %v48_v16 = vld [vmem:[%s677_s1] sm:$0xff]  ;;  %52 = vst.msk [vmem:[#allocation3 + $0x8] sm:$0xff] %vm50_vm2, %v49_v17  ;;  %300 = vmatpush.bf16.msra.mxu3 %v454_v50  ;;  %v453_v51 = vld [vmem:[%s684_s8 + $0x10] sm:$0xff]  ;;  %v452_v52 = vld [vmem:[%s684_s8 + $0x8] sm:$0xff]  ;;  %s507_s1 = smov 64  }
   0xc   :  { %v437_v11 = vld [vmem:[#allocation2] sm:$0xff]  ;;  %51 = vst.msk [vmem:[#allocation3] sm:$0xff] %vm50_vm2, %v48_v16 }
   0xd   :  { %54 = vst.msk [vmem:[#allocation3] sm:$0xff] %vm53_vm3, %v504_v18  ;;  %v461_v20 = vld [vmem:[%s679_s3] ss:$0 sm:$0xff]  ;;  %s505_s3 = smov 112  }
   0xe   :  { %135 = vmatpush.bf16.msra.mxu0 %v442_v6  ;;  %194 = vmatpush.bf16.msra.mxu1 %v448_v13  ;;  %55 = vst.msk [vmem:[#allocation3 + $0x8] sm:$0xff] %vm53_vm3, %v504_v18  ;;  %v462_v27 = vld [vmem:[%s681_s5] ss:$0 sm:$0xff] }
   0xf   :  { %v450_v38 = vld [vmem:[%s682_s6] sm:$0xff]  ;;  %301 = vmatpush.bf16.msra.mxu3 %v453_v51 }
  0x10   :  { %247 = vmatpush.bf16.msra.mxu2 %v450_v38  ;;  %v451_v53 = vld [vmem:[%s684_s8] sm:$0xff] }
  0x11   :  { %v463_v55 = vld [vmem:[%s683_s7] ss:$0 sm:$0xff]  ;;  %s506_s7 = smov [#allocation4]  }
  0x12   :  { %136 = vmatpush.bf16.msra.mxu0 %v441_v7  ;;  %195 = vmatpush.bf16.msra.mxu1 %v447_v14  ;;  %v464_v62 = vld [vmem:[%s685_s9] ss:$0 sm:$0xff]  ;;  %s340_s8 = sshll.u32 %s506_s7, 4  ;;  %s341_s8 = int_to_ptr.vmem [resolvable:$true] %s340_s8 }
  0x13   :  { %302 = vmatpush.bf16.msra.mxu3 %v452_v52 }
  0x14   :  { %v203_v42 = vld [vmem:[#allocation3] sm:$0xff] }
  0x15   :  { %v204_v43 = vld [vmem:[#allocation3 + $0x8] sm:$0xff] }
  0x16   :  { %137 = vmatpush.bf16.msra.mxu0 %v440_v8  ;;  %196 = vmatpush.bf16.msra.mxu1 %v446_v15 }
  0x17   :  { %303 = vmatpush.bf16.msra.mxu3 %v451_v53 }
  0x1a   :  { %138 = vmatpush.bf16.msra.mxu0 %v439_v9 }
  0x1e   :  { %139 = vmatpush.bf16.msra.mxu0 %v438_v10 }
  0x21   :  { %140 = vmatmul.bf16.vlgmr.msra.gmra.mxu0 %v437_v11 }
  0x9e   :  { %v141_v19 = vpop.f32.mrf.mxu0 }
  0x9f   :  { %v142_v21 = vadd.f32 %v461_v20, %v141_v19 }
  0xa1   :  { %v146_v24 = vmax.f32 %v142_v21, 0.0 }
  0xa6   :  { %v143_v22 = vpop.f32.mrf.mxu0 }
  0xa7   :  { %v144_v23 = vadd.f32 %v461_v20, %v143_v22 }
  0xa9   :  { %v147_v25 = vmax.f32 %v144_v23, 0.0 }
  0xab   :  { %v148_v26 = vpack.c.bf16 %v147_v25, %v146_v24 }
  0xad   :  { %414 = vmatmul.msk.bf16.vlgmr.msra.gmra.mxu1 %vm185_vm4, %v148_v26 }
 0x12a   :  { %v198_v28 = vpop.f32.mrf.mxu1 }
 0x12b   :  { %v199_v29 = vadd.f32 %v462_v27, %v198_v28 }
 0x12d   :  { %324 = vst.msk [vmem:[%s687_s11] sm:$0xff] %vm50_vm2, %v199_v29  ;;  %328 = vrot.lane.b32.xlu1 %v199_v29, %s505_s3  ;;  %v205_v30 = vmul.f32 0.5, %v199_v29 }
 0x12f   :  { %v207_v31 = vmul.f32 1.442695, %v205_v30 }
 0x131   :  { %465 = vpow2.f32 %v207_v31 }
 0x132   :  { %v200_v32 = vpop.f32.mrf.mxu1 }
 0x133   :  { %v201_v33 = vadd.f32 %v462_v27, %v200_v32 }
 0x135   :  { %v206_v34 = vmul.f32 0.5, %v201_v33  ;;  %325 = vst.msk [vmem:[%s687_s11 + $0x8] sm:$0xff] %vm50_vm2, %v201_v33  ;;  %330 = vrot.lane.b32.xlu1 %v201_v33, %s505_s3 }
 0x137   :  { %v466_v35 = vpop.eup %465  ;;  %v209_v36 = vmul.f32 1.442695, %v206_v34 }
 0x138   :  { %213 = vrot.lane.b32.xlu0 %v466_v35, %s505_s3 }
 0x139   :  { %467 = vpow2.f32 %v209_v36 }
 0x13f   :  { %v468_v37 = vpop.eup %467 }
 0x140   :  { %215 = vrot.lane.b32.xlu0 %v468_v37, %s505_s3 }
 0x19f   :  { %v329_v39 = vpop.permute.xlu1 %328 }
 0x1a0   :  { %334 = vst.msk [vmem:[%s688_s12] sm:$0xff] %vm50_vm2, %v329_v39 }
 0x1a7   :  { %v331_v40 = vpop.permute.xlu1 %330 }
 0x1a8   :  { %335 = vst.msk [vmem:[%s688_s12 + $0x8] sm:$0xff] %vm50_vm2, %v331_v40 }
 0x1aa   :  { %v214_v41 = vpop.permute.xlu0 %213 }
 0x1ab   :  { %v219_v44 = vmul.f32 %v214_v41, %v203_v42 }
 0x1ad   :  { %v221_v47 = vadd.f32 %v219_v44, %v199_v29 }
 0x1b2   :  { %v216_v45 = vpop.permute.xlu0 %215 }
 0x1b3   :  { %v220_v46 = vmul.f32 %v216_v45, %v204_v43 }
 0x1b5   :  { %v222_v48 = vadd.f32 %v220_v46, %v201_v33 }
 0x1b7   :  { %v223_v49 = vpack.c.bf16 %v222_v48, %v221_v47 }
 0x1b9   :  { %419 = vmatmul.msk.bf16.vlgmr.msra.gmra.mxu2 %vm236_vm5, %v223_v49 }
 0x23c   :  { %v249_v54 = vpop.f32.mrf.mxu2 }
 0x23d   :  { %v250_v56 = vadd.f32 %v463_v55, %v249_v54 }
 0x23f   :  { %v254_v59 = vmax.f32 %v250_v56, 0.0 }
 0x244   :  { %v251_v57 = vpop.f32.mrf.mxu2 }
 0x245   :  { %v252_v58 = vadd.f32 %v463_v55, %v251_v57 }
 0x247   :  { %v255_v60 = vmax.f32 %v252_v58, 0.0 }
 0x249   :  { %v256_v61 = vpack.c.bf16 %v255_v60, %v254_v59 }
 0x24b   :  { %436 = vmatmul.msk.bf16.vlgmr.msra.gmra.mxu3 %vm185_vm4, %v256_v61 }
 0x2ce   :  { %v305_v63 = vpop.f32.mrf.mxu3 }
 0x2cf   :  { %v306_v0 = vadd.f32 %v464_v62, %v305_v63 }
 0x2d1   :  { %v310_v1 = vsub.f32 0.0, %v306_v0 }
 0x2d3   :  { %v312_v2 = vmul.f32 1.442695, %v310_v1 }
 0x2d5   :  { %469 = vpow2.f32 %v312_v2 }
 0x2d6   :  { %v307_v3 = vpop.f32.mrf.mxu3 }
 0x2d7   :  { %v308_v4 = vadd.f32 %v464_v62, %v307_v3 }
 0x2d9   :  { %v311_v5 = vsub.f32 0.0, %v308_v4 }
 0x2db   :  { %v470_v6 = vpop.eup %469  ;;  %v314_v7 = vmul.f32 1.442695, %v311_v5 }
 0x2dc   :  { %v316_v8 = vadd.f32 1.0, %v470_v6 }
 0x2dd   :  { %471 = vpow2.f32 %v314_v7 }
 0x2de   :  { %473 = vrcp.f32 %v316_v8 }
 0x2e3   :  { %v472_v9 = vpop.eup %471 }
 0x2e4   :  { %v474_v10 = vpop.eup %473  ;;  %v317_v11 = vadd.f32 1.0, %v472_v9 }
 0x2e5   :  { %v320_v12 = vpack.c.bf16 %v474_v10, %v474_v10 }
 0x2e6   :  { %475 = vrcp.f32 %v317_v11 }
 0x2e7   :  { %322 = vst.msk [vmem:[#allocation4] sm:$0xf] %vm42_vm0, %v320_v12 }
 0x2ec   :  { %v476_v13 = vpop.eup %475 }
 0x2ed   :  { %v321_v14 = vpack.c.bf16 %v476_v13, %v476_v13 }
 0x2ef   :  { %323 = vst.msk [vmem:[#allocation4 + $0x4] sm:$0xf] %vm42_vm0, %v321_v14 }
 0x2f0   :  { %348 = dma.vmem_to_hbm [thread:$0]  %s341_s8, 128, %s343_s0, [#allocation5], %s507_s1, %s507_s1, %s508_s15  }
 0x2f1   :  { %501 = dma.done.wait [#allocation5], 128  }
 0x2f2   :  { %502 = vsyncadd [#allocation5], 4294967168 }
 0x2f3   :  { %361 = vsyncpa [#allocation5], 1 }

</bundles_post_ra>
